<compile_context>
chip_gen: v6e
topology: v6e:2x2x1
jax: 0.10.0
libtpu: 0.0.40
codegen_flags: <defaults>
</compile_context>

<pallas_src>
import jax
import jax.numpy as jnp
from jax.experimental import pallas as pl
from jax.experimental.pallas import tpu as pltpu


def _colbert_scores_kernel(q_ref, d_ref, out_ref):
    """One (pair, batch-tile, doc-tile) grid step.

    q_ref   : (1, TB, N, D)  bf16 query tile
    d_ref   : (1, S, TC, D)  bf16 doc tile (doc-token axis leading)
    out_ref : (1, TB, TC)    f32 score tile
    """
    _, TB, N, D = q_ref.shape
    _, S, TC, _ = d_ref.shape
    M = TB * N

    # Fill the MXU M dimension with TB*N rows (leading-dim merge, no relayout).
    q = q_ref[...].reshape(M, D)                       # (M, D) bf16

    def body(s, acc):
        d_s = d_ref[0, s]                              # (TC, D) bf16, contiguous slab
        sim = jax.lax.dot_general(                     # (M, TC) f32 on the MXU
            q, d_s,
            dimension_numbers=(((1,), (1,)), ((), ())),
            preferred_element_type=jnp.float32,
        )
        return jnp.maximum(acc, sim)                   # running max over doc tokens (VPU)

    init = jnp.full((M, TC), -jnp.inf, dtype=jnp.float32)
    max_sim = jax.lax.fori_loop(0, S, body, init)      # (M, TC)

    # Sum over query tokens: leading-dim split + sublane reduce (lanes stay = TC).
    scores = max_sim.reshape(TB, N, TC).sum(axis=1)    # (TB, TC)
    out_ref[0] = scores.astype(out_ref.dtype)


def _pick_tile(dim, target, align):
    """Return (tile, padded_dim): a single full block if dim <= target, else
    `align`-aligned tiles with the dim padded to a multiple of the tile."""
    if dim <= target:
        return dim, dim
    tile = max(align, (target // align) * align)
    padded = -(-dim // tile) * tile
    return tile, padded


def _colbert_scores_stacked(q, d):
    """q: (P, B, N, D), d: (P, C, S, D) -> scores (P, B, C) float32."""
    P, B, N, D = q.shape
    Pd, C, S, Dd = d.shape
    assert P == Pd and D == Dd, "Shape mismatch"

    # bf16 operands: 2x MXU rate on v5e/v6e/v7x and half the HBM->VMEM bytes;
    # accumulation stays f32 via preferred_element_type inside the kernel.
    q = q.astype(jnp.bfloat16)
    # Doc-token axis first: the kernel slices contiguous (TC, D) slabs and the
    # (TB, TC) score tile stays lane-dense in the doc axis.
    d = jnp.transpose(d, (0, 2, 1, 3)).astype(jnp.bfloat16)        # (P, S, C, D)

    # Batch tile: fill the MXU M dimension (TB * N >= 256 when possible).
    tb_target = -(-256 // max(N, 1))                    # ceil(256 / N)
    tb_target = max(8, -(-tb_target // 8) * 8)          # round up to multiple of 8
    TB, B_pad = _pick_tile(B, tb_target, 8)

    # Doc tile: lane-dense (multiple of 128) and bounded so the double-buffered
    # (S, TC, D) block stays well inside scoped VMEM on v5e / v7x.
    doc_block_budget = 4 << 20                          # bytes per bf16 doc buffer
    max_tc = max(128, (doc_block_budget // max(S * D * 2, 1)) // 128 * 128)
    TC, C_pad = _pick_tile(C, min(256, max_tc), 128)

    if B_pad != B:
        q = jnp.pad(q, ((0, 0), (0, B_pad - B), (0, 0), (0, 0)))
    if C_pad != C:
        d = jnp.pad(d, ((0, 0), (0, 0), (0, C_pad - C), (0, 0)))

    grid = (P, B_pad // TB, C_pad // TC)

    # Explicit VMEM budget (double-buffered input/output blocks + accumulator).
    q_blk = TB * N * D * 2
    d_blk = S * TC * D * 2
    o_blk = TB * TC * 4
    acc_bytes = TB * N * TC * 4
    vmem_need = 2 * (q_blk + d_blk + o_blk) + acc_bytes + (4 << 20)
    vmem_limit = int(min(64 << 20, max(32 << 20, vmem_need)))

    cost = pl.CostEstimate(
        flops=2 * P * B_pad * N * C_pad * S * D,
        transcendentals=0,
        bytes_accessed=(q.size * q.dtype.itemsize
                        + d.size * d.dtype.itemsize
                        + P * B_pad * C_pad * 4),
    )

    out = pl.pallas_call(
        _colbert_scores_kernel,
        out_shape=jax.ShapeDtypeStruct((P, B_pad, C_pad), jnp.float32),
        grid=grid,
        in_specs=[
            pl.BlockSpec((1, TB, N, D), lambda p, i, j: (p, i, 0, 0)),
            pl.BlockSpec((1, S, TC, D), lambda p, i, j: (p, 0, j, 0)),
        ],
        out_specs=pl.BlockSpec((1, TB, TC), lambda p, i, j: (p, i, j)),
        compiler_params=pltpu.CompilerParams(
            dimension_semantics=("parallel", "parallel", "parallel"),
            vmem_limit_bytes=vmem_limit,
        ),
        cost_estimate=cost,
    )(q, d)

    return out[:, :B, :C]


def colbert_scores(query_embeddings, doc_embeddings):
    """scores[b, c] = sum_n max_s q[b, n, :] . d[c, s, :]  -> (B, C) float32."""
    return _colbert_scores_stacked(query_embeddings[None], doc_embeddings[None])[0]


def colbert_pairwise_distill_loss(query_embeddings,
                                  doc_embeddings,
                                  teacher_query_outputs=None,
                                  teacher_doc_outputs=None,
                                  alpha=0.3,
                                  eval=False):
    """JAX/Pallas port of ColBertPairwiseDistillLoss.forward."""
    B, _, _ = query_embeddings.shape
    Bc, _, _ = doc_embeddings.shape
    if not eval:
        Bt, _, _ = teacher_query_outputs.shape
        Btc, _, _ = teacher_doc_outputs.shape
        assert B == Bc == Bt == Btc, "Shape mismatch"
    else:
        assert B == Bc, "Shape mismatch"

    teacher_scores = None
    if (not eval
            and teacher_query_outputs.shape == query_embeddings.shape
            and teacher_doc_outputs.shape == doc_embeddings.shape):
        # Fuse student + teacher score passes into one pallas_call
        # (extra leading "parallel" grid axis): one launch, overlapped DMA.
        q_stack = jnp.stack([query_embeddings, teacher_query_outputs], axis=0)
        d_stack = jnp.stack([doc_embeddings, teacher_doc_outputs], axis=0)
        both = _colbert_scores_stacked(q_stack, d_stack)            # (2, B, B)
        scores, teacher_scores = both[0], both[1]
    else:
        scores = colbert_scores(query_embeddings, doc_embeddings)
        if not eval:
            teacher_scores = colbert_scores(teacher_query_outputs,
                                            teacher_doc_outputs)

    pos_scores = jnp.diag(scores)
    mask = jnp.eye(scores.shape[0], dtype=bool)
    s_masked = jnp.where(mask, -jnp.inf, scores)
    neg_scores = jnp.max(s_masked, axis=1)
    contrastive_loss = jnp.mean(jax.nn.softplus(neg_scores - pos_scores))

    if eval:
        return contrastive_loss

    # fp16 MSE to match torch MSELoss on .half() tensors.
    diff = scores.astype(jnp.float16) - teacher_scores.astype(jnp.float16)
    mse_loss = jnp.mean(diff * diff)
    return contrastive_loss + alpha * mse_loss.astype(jnp.float32)


if __name__ == "__main__":
    # Small ColBERT-like shapes: batch=2, query tokens=8, doc tokens=16, emb_dim=32.
    B, NQ, NC, D = 2, 8, 16, 32
    key = jax.random.PRNGKey(0)
    k1, k2, k3, k4 = jax.random.split(key, 4)

    query_embeddings = jax.random.normal(k1, (B, NQ, D), dtype=jnp.float32)
    doc_embeddings = jax.random.normal(k2, (B, NC, D), dtype=jnp.float32)
    # Deterministic synthetic "teacher" outputs (student + small perturbation).
    teacher_query_outputs = query_embeddings + 0.05 * jax.random.normal(
        k3, (B, NQ, D), dtype=jnp.float32)
    teacher_doc_outputs = doc_embeddings + 0.05 * jax.random.normal(
        k4, (B, NC, D), dtype=jnp.float32)

    # Spot-check the Pallas score kernel against a pure-JAX reference
    # (bf16 matmul inside the kernel -> loose tolerance).
    pallas_scores = jax.block_until_ready(
        colbert_scores(query_embeddings, doc_embeddings))
    ref_scores = jnp.einsum('bnd,csd->bcns', query_embeddings,
                            doc_embeddings).max(axis=3).sum(axis=2)
    assert jnp.allclose(pallas_scores, ref_scores, rtol=2e-2, atol=1e-1)

    loss = colbert_pairwise_distill_loss(
        query_embeddings, doc_embeddings,
        teacher_query_outputs, teacher_doc_outputs,
        alpha=0.3, eval=False)
    loss = jax.block_until_ready(loss)

    # Also exercise the eval path once.
    eval_loss = jax.block_until_ready(
        colbert_pairwise_distill_loss(query_embeddings, doc_embeddings,
                                      eval=True))

    assert jnp.isfinite(loss) and jnp.isfinite(eval_loss)
    print("KERNEL_OK")
</pallas_src>

<mosaic_0001>
module attributes {stable_mosaic.version = 11 : i64} {
  func.func @_colbert_scores_kernel(%arg0: i32, %arg1: i32, %arg2: i32, %arg3: memref<1x2x8x32xbf16, #tpu.memory_space<vmem>>, %arg4: memref<1x16x2x32xbf16, #tpu.memory_space<vmem>>, %arg5: memref<1x2x2xf32, #tpu.memory_space<vmem>>) attributes {dimension_semantics = [#tpu.dimension_semantics<parallel>, #tpu.dimension_semantics<parallel>, #tpu.dimension_semantics<parallel>], iteration_bounds = array<i64: 1, 1, 1>, scalar_prefetch = 0 : i64, scratch_operands = 0 : i64, tpu.core_type = #tpu.core_type<tc>, window_params = [{transform_indices = @transform_0, window_bounds = array<i64: 1, 2, 8, 32>}, {transform_indices = @transform_1, window_bounds = array<i64: 1, 16, 2, 32>}, {transform_indices = @transform_2, window_bounds = array<i64: 1, 2, 2>}]} {
    %c0 = arith.constant 0 : index
    %c0_0 = arith.constant 0 : index
    %c0_1 = arith.constant 0 : index
    %c0_2 = arith.constant 0 : index
    %0 = vector.load %arg3[%c0, %c0_0, %c0_1, %c0_2] : memref<1x2x8x32xbf16, #tpu.memory_space<vmem>>, vector<1x2x8x32xbf16>
    %1 = vector.shape_cast %0 : vector<1x2x8x32xbf16> to vector<16x32xbf16>
    %cst = arith.constant 0xFF800000 : f32
    %2 = vector.broadcast %cst : f32 to vector<16x2xf32>
    %c0_i32 = arith.constant 0 : i32
    %c16_i32 = arith.constant 16 : i32
    %3 = arith.addi %c0_i32, %c16_i32 : i32
    %c1_i32 = arith.constant 1 : i32
    %4 = scf.for %arg6 = %c0_i32 to %3 step %c1_i32 iter_args(%arg7 = %2) -> (vector<16x2xf32>)  : i32 {
      %c0_8 = arith.constant 0 : index
      %10 = arith.index_cast %arg6 : i32 to index
      %c0_9 = arith.constant 0 : index
      %c0_10 = arith.constant 0 : index
      %11 = vector.load %arg4[%c0_8, %10, %c0_9, %c0_10] : memref<1x16x2x32xbf16, #tpu.memory_space<vmem>>, vector<1x1x2x32xbf16>
      %12 = vector.shape_cast %11 : vector<1x1x2x32xbf16> to vector<2x32xbf16>
      %cst_11 = arith.constant dense<0.000000e+00> : vector<16x2xf32>
      %13 = tpu.matmul %1, %12, %cst_11 {dimension_numbers = #tpu.dot_dimension_numbers<[1], [1], [0], [0], [0, 0, 1, 0], [], []>} : vector<16x32xbf16>, vector<2x32xbf16>, vector<16x2xf32> -> vector<16x2xf32>
      %14 = arith.maximumf %arg7, %13 : vector<16x2xf32>
      scf.yield %14 : vector<16x2xf32>
    }
    %c16_i32_3 = arith.constant 16 : i32
    %5 = vector.shape_cast %4 : vector<16x2xf32> to vector<2x8x2xf32>
    %cst_4 = arith.constant dense<0.000000e+00> : vector<2x2xf32>
    %6 = vector.multi_reduction <add>, %5, %cst_4 [1] : vector<2x8x2xf32> to vector<2x2xf32>
    %c0_5 = arith.constant 0 : index
    %c0_6 = arith.constant 0 : index
    %c0_7 = arith.constant 0 : index
    %7 = vector.load %arg5[%c0_5, %c0_6, %c0_7] : memref<1x2x2xf32, #tpu.memory_space<vmem>>, vector<1x2x2xf32>
    %8 = vector.shape_cast %7 : vector<1x2x2xf32> to vector<2x2xf32>
    %9 = vector.shape_cast %6 : vector<2x2xf32> to vector<1x2x2xf32>
    tpu.vector_store %arg5[%c0_5, %c0_6, %c0_7], %9 {strides = array<i32>} : memref<1x2x2xf32, #tpu.memory_space<vmem>>, vector<1x2x2xf32>,
    return
  }
  func.func @transform_0(%arg0: i32, %arg1: i32, %arg2: i32) -> (i32, i32, i32, i32) {
    %c0_i32 = arith.constant 0 : i32
    %c0_i32_0 = arith.constant 0 : i32
    %c0_i32_1 = arith.constant 0 : i32
    return %arg0, %arg1, %c0_i32, %c0_i32_0 : i32, i32, i32, i32
  }
  func.func @transform_1(%arg0: i32, %arg1: i32, %arg2: i32) -> (i32, i32, i32, i32) {
    %c0_i32 = arith.constant 0 : i32
    %c0_i32_0 = arith.constant 0 : i32
    %c0_i32_1 = arith.constant 0 : i32
    return %arg0, %c0_i32, %arg2, %c0_i32_0 : i32, i32, i32, i32
  }
  func.func @transform_2(%arg0: i32, %arg1: i32, %arg2: i32) -> (i32, i32, i32) {
    %c0_i32 = arith.constant 0 : i32
    return %arg0, %arg1, %arg2 : i32, i32, i32
  }
}

</mosaic_0001>

<bundles_post_ra>
// kernel: tpu_custom_call.1
= control target key start
LH: loop header
LB: loop body
LE: loop exit
PB: predicated region body
PF: predicated region fallthrough
CT: control target
= control target key end

     0   :  { %7 = vsyncpa [#allocation3], 0  ;;  %s324_s0 = inlined_call_operand.hbm [shape: bf16[1,2,8,32], index: 0, kind: input, shape index: {}]   ;;  %s325_s1 = inlined_call_operand.hbm [shape: bf16[1,16,2,32], index: 1, kind: input, shape index: {}]   ;;  %s326_s2 = inlined_call_operand.hbm [shape: f32[1,2,2], index: 2, kind: output, shape index: {}]  }
   0x1   :  { %8 = vsyncpa [#allocation6], 0 }
   0x2   :  { %9 = vsyncpa [#allocation4], 0  ;;  %s291_s9 = smov [#allocation2]  }
   0x3   :  { %s15_s10 = sshll.u32 %s291_s9, 4  ;;  %s16_s10 = int_to_ptr.vmem [resolvable:$true] %s15_s10 }
   0x4   :  { %s209_s11 = scalar_lea.vmem %s16_s10, 128  ;;  %p214_p1 = scmp.lt.s32.totalorder %s16_s10, %s16_s10 }
   0x5   :  { %p210_p0 = scmp.ne.s32.totalorder %s16_s10, %s209_s11  ;;  %p215_p2 = scmp.lt.s32.totalorder %s209_s11, %s209_s11 }
   0x7   :  { %p216_p3 = por %p215_p2, %p214_p1 }
   0x9   :  { %p217_p4 = pnand %p216_p3, %p210_p0 }
   0xb   :  { %220 = shalt.err (!%p217_p4)
}
   0xc   :  { %s292_s12 = smov 64   ;;  %s293_s13 = smov 4  }
   0xd   :  { %21 = dma.hbm_to_vmem [thread:$0]  %s324_s0, 128, %s16_s10, [#allocation3], %s292_s12, %s292_s12, %s293_s13  }
   0xe   :  { %s294_s16 = smov [#allocation5]  }
   0xf   :  { %s27_s17 = sshll.u32 %s294_s16, 4  ;;  %s28_s17 = int_to_ptr.vmem [resolvable:$true] %s27_s17 }
  0x10   :  { %s229_s18 = scalar_lea.vmem %s28_s17, 256  ;;  %p234_p6 = scmp.lt.s32.totalorder %s28_s17, %s28_s17 }
  0x11   :  { %p230_p5 = scmp.ne.s32.totalorder %s28_s17, %s229_s18  ;;  %p235_p7 = scmp.lt.s32.totalorder %s229_s18, %s229_s18 }
  0x13   :  { %p236_p8 = por %p235_p7, %p234_p6 }
  0x15   :  { %p237_p9 = pnand %p236_p8, %p230_p5 }
  0x17   :  { %240 = shalt.err (!%p237_p9)
}
  0x18   :  { %s295_s19 = smov 16   ;;  %s296_s20 = smov 1  }
  0x19   :  { %33 = dma.hbm_to_vmem [thread:$0]  %s325_s1, 256, %s28_s17, [#allocation6], %s295_s19, %s295_s19, %s296_s20  }
  0x1a   :  { %273 = dma.done.wait [#allocation3], 128  }
  0x1b   :  { %274 = vsyncadd [#allocation3], 4294967168 }
  0x1c   :  { %275 = dma.done.wait [#allocation6], 256  }
  0x1d   :  { %276 = vsyncadd [#allocation6], 4294967040  ;;  %v41_v0 = vld [vmem:[#allocation2] sm:$0xf]  ;;  %v42_v1 = vld [vmem:[#allocation2 + $0x4] sm:$0xf] }
  0x1e   :  { %v279_v2 = vmov -inf   ;;  %v283_v3 = vmov -inf   ;;  %s287_s0 = smov 0  }
  0x1f LB: > { %v297_v4 = vmov 0.0   ;;  %vm58_vm0 = vcmask 261120   ;;  %vm298_vm1 = vmmov 0   ;;  %s51_s1 = scalar_lea.vmem [#allocation5], %s289_s0  ;;  %v158_v7 = vcombine.low %v41_v0, %v42_v1  ;;  %s48_s0 = sadd.s32 1, %s289_s0   ;;  %s289_s0 = sphi %s287_s0, %s48_s0   ;;  %v285_v3 = vphi %v283_v3, %v284_v3   ;;  %v281_v2 = vphi %v279_v2, %v280_v2  }
  0x20   : > { %162 = vmatprep.subr.bf16.mxu0 %v297_v4  ;;  %164 = vmatprep.mubr.msk.bf16.mxu0 %vm298_vm1, %v297_v4  ;;  %v52_v5 = vld [vmem:[%s51_s1] sm:$0x1]  ;;  %p45_p10 = scmp.ge.s32.totalorder %s48_s0, 16  }
  0x21   : > { %v63_v6 = vsel %vm58_vm0, %v52_v5, 0  ;;  %vm108_vm2 = vcmask (%p45_p10), 15360   ;;  %s299_s23 = smov (%p45_p10), [#allocation7]   ;;  %vm125_vm3 = vcmask (%p45_p10), 1041409   ;;  %vm128_vm4 = vcmask (%p45_p10), 9216  }
  0x22   : > { %163 = vmatpush3.bf16.xpose.msra.mxu0 %v63_v6  ;;  %s136_s24 = sshll.u32 (%p45_p10), %s299_s23, 4  ;;  %s137_s24 = int_to_ptr.vmem [resolvable:$true] %s136_s24 }
  0x23   :  { %s241_s25 = scalar_lea.vmem (%p45_p10), %s137_s24, 32  ;;  %p246_p12 = scmp.lt.s32.totalorder (%p45_p10), %s137_s24, %s137_s24 }
  0x24   :  { %p242_p11 = scmp.ne.s32.totalorder (%p45_p10), %s137_s24, %s241_s25  ;;  %p247_p13 = scmp.lt.s32.totalorder (%p45_p10), %s241_s25, %s241_s25 }
  0x26   :  { %p248_p0 = por (%p45_p10), %p247_p13, %p246_p12 }
  0x28   :  { %p249_p1 = pnand (%p45_p10), %p248_p0, %p242_p11 }
  0x29   : > { %165 = vmatmul.mubr.msk.bf16.vlgmr.msra.gmra.mxu0 %vm58_vm0, %v158_v7 }
  0xe9   : > { %v99_v8 = vpop.f32.mrf.mxu0 }
  0xea   : > { %v106_v9 = vmax.f32 %v285_v3, %v99_v8  }
  0xeb   : > { %v166_v10 = vpop.f32.mrf.mxu0 }
  0xec   : > { %v284_v3 = vmov %v106_v9   ;;  %47 = sbr.rel (!%p45_p10) target bundleno = 31 (0x1f), region = 44  ;;  %v109_v14 = vsel (%p45_p10), %vm108_vm2, %v106_v9, 0.0 }
  0xed   : > { %v102_v11 = vpop.f32.mrf.mxu0  ;;  %v110_v16 = vrot.slane (%p45_p10), %v109_v14, 4 }
  0xee   : > { %v107_v12 = vmax.f32 %v281_v2, %v102_v11  }
  0xef   : > { %v167_v13 = vpop.f32.mrf.mxu0  ;;  %v111_v18 = vadd.f32 (%p45_p10), %v110_v16, %v109_v14 }
  0xf0   : > { %v280_v2 = vmov %v107_v12   ;;  %v116_v15 = vsel (%p45_p10), %vm108_vm2, %v107_v12, 0.0 }
  0xf1   :  { %v117_v17 = vrot.slane %v116_v15, 4  ;;  %v112_v20 = vrot.slane %v111_v18, 2 }
  0xf3   :  { %v118_v19 = vadd.f32 %v117_v17, %v116_v15  ;;  %v113_v22 = vadd.f32 %v112_v20, %v111_v18 }
  0xf5   :  { %v119_v21 = vrot.slane %v118_v19, 2  ;;  %v114_v24 = vrot.slane %v113_v22, 1 }
  0xf7   :  { %v120_v23 = vadd.f32 %v119_v21, %v118_v19  ;;  %v115_v26 = vadd.f32 %v114_v24, %v113_v22 }
  0xf9   :  { %v121_v25 = vrot.slane %v120_v23, 1 }
  0xfb   :  { %v122_v27 = vadd.f32 %v121_v25, %v120_v23 }
  0xfd   :  { %v126_v28 = vsel %vm125_vm3, %v122_v27, %v115_v26 }
  0xfe   :  { %129 = vst.msk [vmem:[#allocation7] sm:$0x3] %vm128_vm4, %v126_v28 }
  0xff   :  { %252 = shalt.err (!%p249_p1)
}
 0x100   :  { %139 = dma.vmem_to_hbm [thread:$0]  %s137_s24, 32, %s326_s2, [#allocation4]  }
 0x101   :  { %277 = dma.done.wait [#allocation4], 32  }
 0x102   :  { %278 = vsyncadd [#allocation4], 4294967264 }
 0x103   :  { %143 = vsyncpa [#allocation3], 1 }
 0x104   :  { %144 = vsyncpa [#allocation6], 1 }
 0x105   :  { %145 = vsyncpa [#allocation4], 1 }

</bundles_post_ra>
